<compile_context>
chip_gen: v5e
topology: v5e:2x2
jax: 0.10.0
libtpu: 0.0.40
codegen_flags: <defaults>
</compile_context>

<pallas_src>
import jax
import jax.numpy as jnp
from jax import lax
from jax.experimental import pallas as pl
from jax.experimental.pallas import tpu as pltpu


def _softmax_rows(scores):
    """scores: (TB, S) f32 -> numerically-stable softmax along the last axis."""
    m = jnp.max(scores, axis=-1, keepdims=True)
    e = jnp.exp(scores - m)
    denom = jnp.sum(e, axis=-1, keepdims=True)
    # pl.reciprocal(denom, approx=True) would offload to the EUP slot; kept
    # exact here to preserve 1e-5 parity with the PyTorch reference.
    return e * pl.reciprocal(denom, approx=False)


def _dot_kernel(hid_ref, enc_ref, out_ref):
    hid = hid_ref[...].astype(jnp.float32)                       # (TB, H)
    enc = enc_ref[...].astype(jnp.float32)                       # (S, TB, H)
    # Memory-bound score: VPU multiply + reduce, no MXU matvec / XLU relayout.
    scores_st = jnp.sum(hid[None, :, :] * enc, axis=-1)          # (S, TB)
    out_ref[...] = _softmax_rows(scores_st.T).astype(out_ref.dtype)   # (TB, S)


def _general_kernel(hid_ref, enc_ref, w_ref, b_ref, out_ref):
    hid = hid_ref[...].astype(jnp.float32)                       # (TB, H)
    S, TB, H = enc_ref.shape
    enc2 = enc_ref[...].reshape(S * TB, H)                       # M = S*TB on MXU
    # energy = enc @ W^T + b, contracting last dims (no .T inside the kernel).
    energy = lax.dot_general(enc2, w_ref[...], (((1,), (1,)), ((), ())),
                             preferred_element_type=jnp.float32)  # (S*TB, H)
    energy = (energy + b_ref[...]).reshape(S, TB, H)
    scores_st = jnp.sum(hid[None, :, :] * energy, axis=-1)       # (S, TB)
    out_ref[...] = _softmax_rows(scores_st.T).astype(out_ref.dtype)


def _concat_kernel(hid_ref, enc_ref, w1_ref, w2_ref, b_ref, v_ref, out_ref):
    hid = hid_ref[...].astype(jnp.float32)                       # (TB, H)
    S, TB, H = enc_ref.shape
    # Linear(cat(hidden, enc)) = hidden @ W[:, :H]^T + enc @ W[:, H:]^T + b
    e_h = lax.dot_general(hid, w1_ref[...], (((1,), (1,)), ((), ())),
                          preferred_element_type=jnp.float32)    # (TB, H)
    enc2 = enc_ref[...].reshape(S * TB, H)                       # M = S*TB on MXU
    e_e = lax.dot_general(enc2, w2_ref[...], (((1,), (1,)), ((), ())),
                          preferred_element_type=jnp.float32)    # (S*TB, H)
    energy = jnp.tanh(e_h[None, :, :] + e_e.reshape(S, TB, H) + b_ref[...])
    scores_st = jnp.sum(v_ref[...] * energy, axis=-1)            # (S, TB)
    out_ref[...] = _softmax_rows(scores_st.T).astype(out_ref.dtype)


def _batch_tile(B):
    # Whole batch per program for tiny B (block dims == full array dims keeps
    # the (8,128) rule satisfied); otherwise 8 rows (f32 sublane fill), giving
    # >= 2 parallel grid tiles for B >= 16 (megacore / v7x dual-TC).
    return B if B <= 8 else 8


def attn_forward(method, hidden, encoder_outputs, params):
    """hidden: (1, B, H), encoder_outputs: (S, B, H) -- PyTorch layouts.

    Returns (B, 1, S) attention weights, matching the PyTorch forward."""
    S, B, H = encoder_outputs.shape
    hid = hidden.reshape(B, H)                  # free reshape, no HBM transpose
    tb = _batch_tile(B)
    grid = (pl.cdiv(B, tb),)

    hid_spec = pl.BlockSpec((tb, H), lambda b: (b, 0))
    enc_spec = pl.BlockSpec((S, tb, H), lambda b: (0, b, 0))
    out_spec = pl.BlockSpec((tb, S), lambda b: (b, 0))

    def wspec(shape):            # constant-index weight/bias/v blocks (resident)
        return pl.BlockSpec(shape, lambda b: (0,) * len(shape))

    out_shape = jax.ShapeDtypeStruct((B, S), jnp.float32)

    # Explicit VMEM budget: double-buffered hid/enc/out blocks + weights + slack.
    # TODO(synk): for very long S*H (v7x: 64 MiB VMEM), tile the S axis with an
    # online-softmax accumulator instead of loading the full (S, TB, H) block.
    weight_bytes = sum(int(p.size) * 4 for p in params.values())
    block_bytes = 2 * 4 * (tb * H + S * tb * H + tb * S)
    vmem_limit = int(min(max(block_bytes + 2 * weight_bytes + (2 << 20), 8 << 20),
                         48 << 20))
    cp = pltpu.CompilerParams(dimension_semantics=("parallel",),
                              vmem_limit_bytes=vmem_limit)

    if method == "dot":
        out = pl.pallas_call(
            _dot_kernel, out_shape=out_shape, grid=grid,
            in_specs=[hid_spec, enc_spec], out_specs=out_spec,
            compiler_params=cp,
        )(hid, encoder_outputs)
    elif method == "general":
        w, b = params["attn_w"], params["attn_b"]
        out = pl.pallas_call(
            _general_kernel, out_shape=out_shape, grid=grid,
            in_specs=[hid_spec, enc_spec, wspec((H, H)), wspec((1, H))],
            out_specs=out_spec, compiler_params=cp,
        )(hid, encoder_outputs, w, b.reshape(1, H))
    elif method == "concat":
        w, b, v = params["attn_w"], params["attn_b"], params["v"]
        w1, w2 = w[:, :H], w[:, H:]          # split of the (H, 2H) Linear weight
        out = pl.pallas_call(
            _concat_kernel, out_shape=out_shape, grid=grid,
            in_specs=[hid_spec, enc_spec, wspec((H, H)), wspec((H, H)),
                      wspec((1, H)), wspec((1, H))],
            out_specs=out_spec, compiler_params=cp,
        )(hid, encoder_outputs, w1, w2, b.reshape(1, H), v.reshape(1, H))
    else:
        raise ValueError(method, "is not an appropriate attention method.")
    return out[:, None, :]                    # (B, 1, S), free unsqueeze


def attn_forward_ref(method, hidden, encoder_outputs, params):
    """Pure-JAX reference mirroring the PyTorch forward exactly."""
    if method == "dot":
        scores = jnp.sum(hidden * encoder_outputs, axis=2)
    elif method == "general":
        energy = encoder_outputs @ params["attn_w"].T + params["attn_b"]
        scores = jnp.sum(hidden * energy, axis=2)
    elif method == "concat":
        S, B, H = encoder_outputs.shape
        hid_e = jnp.broadcast_to(hidden, (S, B, H))
        cat = jnp.concatenate([hid_e, encoder_outputs], axis=2)
        energy = jnp.tanh(cat @ params["attn_w"].T + params["attn_b"])
        scores = jnp.sum(params["v"] * energy, axis=2)
    scores_t = scores.T                                       # (B, S)
    return jax.nn.softmax(scores_t, axis=1)[:, None, :]       # (B, 1, S)


if __name__ == "__main__":
    S, H = 8, 32
    key = jax.random.PRNGKey(0)
    k3, k4, k5 = jax.random.split(key, 3)

    params = {
        "dot": {},
        "general": {
            "attn_w": jax.random.normal(k3, (H, H), jnp.float32) * 0.1,
            "attn_b": jax.random.normal(k4, (H,), jnp.float32) * 0.1,
        },
        "concat": {
            "attn_w": jax.random.normal(k3, (H, 2 * H), jnp.float32) * 0.1,
            "attn_b": jax.random.normal(k4, (H,), jnp.float32) * 0.1,
            "v": jax.random.normal(k5, (H,), jnp.float32) * 0.1,
        },
    }

    # B=2 exercises the single-tile (tb=B) path; B=16 exercises tb=8 with a
    # 2-step "parallel" grid (multiple batch rows per program).
    for B in (2, 16):
        kh, ke = jax.random.split(jax.random.PRNGKey(B), 2)
        hidden = jax.random.normal(kh, (1, B, H), jnp.float32)
        encoder_outputs = jax.random.normal(ke, (S, B, H), jnp.float32)
        for method in ("dot", "general", "concat"):
            out = jax.block_until_ready(
                attn_forward(method, hidden, encoder_outputs, params[method]))
            ref = attn_forward_ref(method, hidden, encoder_outputs, params[method])
            assert out.shape == (B, 1, S), (method, B, out.shape)
            assert jnp.allclose(out, ref, atol=1e-5, rtol=1e-5), (method, B)

    print("KERNEL_OK")
</pallas_src>

<mosaic_0001>
module attributes {stable_mosaic.version = 11 : i64} {
  func.func @_dot_kernel(%arg0: i32, %arg1: memref<2x32xf32, #tpu.memory_space<vmem>>, %arg2: memref<8x2x32xf32, #tpu.memory_space<vmem>>, %arg3: memref<2x8xf32, #tpu.memory_space<vmem>>) attributes {dimension_semantics = [#tpu.dimension_semantics<parallel>], iteration_bounds = array<i64: 1>, scalar_prefetch = 0 : i64, scratch_operands = 0 : i64, tpu.core_type = #tpu.core_type<tc>, window_params = [{transform_indices = @transform_0, window_bounds = array<i64: 2, 32>}, {transform_indices = @transform_1, window_bounds = array<i64: 8, 2, 32>}, {transform_indices = @transform_2, window_bounds = array<i64: 2, 8>}]} {
    %c0 = arith.constant 0 : index
    %c0_0 = arith.constant 0 : index
    %0 = vector.load %arg1[%c0, %c0_0] : memref<2x32xf32, #tpu.memory_space<vmem>>, vector<2x32xf32>
    %c0_1 = arith.constant 0 : index
    %c0_2 = arith.constant 0 : index
    %c0_3 = arith.constant 0 : index
    %1 = vector.load %arg2[%c0_1, %c0_2, %c0_3] : memref<8x2x32xf32, #tpu.memory_space<vmem>>, vector<8x2x32xf32>
    %2 = vector.shape_cast %0 : vector<2x32xf32> to vector<1x2x32xf32>
    %3 = vector.broadcast %2 : vector<1x2x32xf32> to vector<8x2x32xf32>
    %4 = arith.mulf %3, %1 : vector<8x2x32xf32>
    %cst = arith.constant dense<0.000000e+00> : vector<8x2xf32>
    %5 = vector.multi_reduction <add>, %4, %cst [2] : vector<8x2x32xf32> to vector<8x2xf32>
    %6 = tpu.transpose %5, [1, 0] : vector<8x2xf32> -> vector<2x8xf32>
    %cst_4 = arith.constant dense<0xFF800000> : vector<2xf32>
    %7 = vector.multi_reduction <maximumf>, %6, %cst_4 [1] : vector<2x8xf32> to vector<2xf32>
    %8 = vector.shape_cast %7 : vector<2xf32> to vector<2x1xf32>
    %9 = vector.broadcast %8 : vector<2x1xf32> to vector<2x8xf32>
    %10 = arith.subf %6, %9 : vector<2x8xf32>
    %11 = math.exp %10 : vector<2x8xf32>
    %cst_5 = arith.constant dense<0.000000e+00> : vector<2xf32>
    %12 = vector.multi_reduction <add>, %11, %cst_5 [1] : vector<2x8xf32> to vector<2xf32>
    %13 = vector.shape_cast %12 : vector<2xf32> to vector<2x1xf32>
    %14 = tpu.reciprocal %13 : vector<2x1xf32> -> vector<2x1xf32>
    %15 = vector.broadcast %14 : vector<2x1xf32> to vector<2x8xf32>
    %16 = arith.mulf %11, %15 : vector<2x8xf32>
    %c0_6 = arith.constant 0 : index
    %c0_7 = arith.constant 0 : index
    %17 = vector.load %arg3[%c0_6, %c0_7] : memref<2x8xf32, #tpu.memory_space<vmem>>, vector<2x8xf32>
    tpu.vector_store %arg3[%c0_6, %c0_7], %16 {strides = array<i32>} : memref<2x8xf32, #tpu.memory_space<vmem>>, vector<2x8xf32>,
    return
  }
  func.func @transform_0(%arg0: i32) -> (i32, i32) {
    %c0_i32 = arith.constant 0 : i32
    %c0_i32_0 = arith.constant 0 : i32
    return %arg0, %c0_i32 : i32, i32
  }
  func.func @transform_1(%arg0: i32) -> (i32, i32, i32) {
    %c0_i32 = arith.constant 0 : i32
    %c0_i32_0 = arith.constant 0 : i32
    %c0_i32_1 = arith.constant 0 : i32
    return %c0_i32, %arg0, %c0_i32_0 : i32, i32, i32
  }
  func.func @transform_2(%arg0: i32) -> (i32, i32) {
    %c0_i32 = arith.constant 0 : i32
    %c0_i32_0 = arith.constant 0 : i32
    return %arg0, %c0_i32 : i32, i32
  }
}

</mosaic_0001>

<bundles_post_ra>
// kernel: tpu_custom_call.1
= control target key start
LH: loop header
LB: loop body
LE: loop exit
PB: predicated region body
PF: predicated region fallthrough
CT: control target
= control target key end

     0   :  { %7 = vsyncpa [#allocation3], 0  ;;  %s321_s0 = inlined_call_operand.hbm [shape: f32[2,32], index: 0, kind: input, shape index: {}]   ;;  %s322_s1 = inlined_call_operand.hbm [shape: f32[8,2,32], index: 1, kind: input, shape index: {}]   ;;  %s323_s2 = inlined_call_operand.hbm [shape: f32[2,8], index: 2, kind: output, shape index: {}]  }
   0x1   :  { %8 = vsyncpa [#allocation6], 0 }
   0x2   :  { %9 = vsyncpa [#allocation4], 0  ;;  %s15_s11 = sshll.u32 %s321_s0, 4  ;;  %s281_s12 = smov [#allocation2]   ;;  %s16_s11 = int_to_ptr.hbm [resolvable:$true] %s15_s11 }
   0x3   :  { %s17_s13 = sshll.u32 %s281_s12, 4  ;;  %s25_s16 = sshll.u32 %s322_s1, 4  ;;  %s18_s13 = int_to_ptr.vmem [resolvable:$true] %s17_s13  ;;  %s26_s16 = int_to_ptr.hbm [resolvable:$true] %s25_s16 }
   0x4   :  { %20 = dma.hbm_to_vmem [thread:$0]  %s16_s11, 32, %s18_s13, [#allocation3]  }
   0x5   :  { %s282_s17 = smov [#allocation5]   ;;  %s283_s19 = smov 32  }
   0x6   :  { %s27_s18 = sshll.u32 %s282_s17, 4  ;;  %s284_s20 = smov 2   ;;  %s28_s18 = int_to_ptr.vmem [resolvable:$true] %s27_s18 }
   0x7   :  { %33 = dma.hbm_to_vmem [thread:$0]  %s26_s16, 256, %s28_s18, [#allocation6], %s283_s19, %s283_s19, %s284_s20  }
   0x8   :  { %275 = dma.done.wait [#allocation3], 32  }
   0x9   :  { %276 = vsyncadd [#allocation3], 4294967264 }
   0xa   :  { %277 = dma.done.wait [#allocation6], 256  }
   0xb   :  { %278 = vsyncadd [#allocation6], 4294967040  ;;  %vm59_vm0 = vcmask 254976   ;;  %v42_v0 = vld [vmem:[#allocation2] sm:$0x3]  ;;  %v92_v27 = vlaneseq  ;;  %vm102_vm1 = vcmask 1041409  }
   0xc   :  { %v43_v1 = vld [vmem:[#allocation5] sm:$0x3]  ;;  %v45_v2 = vld [vmem:[#allocation5 + $0x4] sm:$0x3]  ;;  %v47_v5 = vld [vmem:[#allocation5 + $0x8] sm:$0x3] }
   0xd   :  { %v51_v3 = vmul.f32 %v43_v1, %v42_v0  ;;  %v53_v4 = vmul.f32 %v45_v2, %v42_v0  ;;  %v55_v6 = vmul.f32 %v47_v5, %v42_v0  ;;  %v44_v7 = vld [vmem:[#allocation5 + $0x2] sm:$0x3]  ;;  %v46_v8 = vld [vmem:[#allocation5 + $0x6] sm:$0x3]  ;;  %v48_v11 = vld [vmem:[#allocation5 + $0xa] sm:$0x3] }
   0xe   :  { %v52_v13 = vmul.f32 %v44_v7, %v42_v0  ;;  %v54_v14 = vmul.f32 %v46_v8, %v42_v0  ;;  %v56_v15 = vmul.f32 %v48_v11, %v42_v0  ;;  %v49_v19 = vld [vmem:[#allocation5 + $0xc] sm:$0x3]  ;;  %v50_v20 = vld [vmem:[#allocation5 + $0xe] sm:$0x3]  ;;  %v93_v29 = vand.u32 127, %v92_v27  ;;  %s285_s0 = smov [#allocation7]  }
   0xf   :  { %v60_v9 = vsel %vm59_vm0, %v51_v3, 0.0  ;;  %v66_v10 = vsel %vm59_vm0, %v53_v4, 0.0  ;;  %v72_v12 = vsel %vm59_vm0, %v55_v6, 0.0  ;;  %v57_v21 = vmul.f32 %v49_v19, %v42_v0  ;;  %s180_s1 = sshll.u32 %s285_s0, 4  ;;  %s182_s23 = sshll.u32 %s323_s2, 4  ;;  %s181_s1 = int_to_ptr.vmem [resolvable:$true] %s180_s1  ;;  %s183_s23 = int_to_ptr.hbm [resolvable:$true] %s182_s23 }
  0x10   :  { %61 = vadd.xlane.f32.xlu0 %v60_v9  ;;  %67 = vadd.xlane.f32.xlu1 %v66_v10  ;;  %v63_v16 = vsel %vm59_vm0, %v52_v13, 0.0  ;;  %v69_v17 = vsel %vm59_vm0, %v54_v14, 0.0  ;;  %v75_v18 = vsel %vm59_vm0, %v56_v15, 0.0  ;;  %v58_v22 = vmul.f32 %v50_v20, %v42_v0 }
  0x11   :  { %73 = vadd.xlane.f32.xlu2 %v72_v12  ;;  %v78_v23 = vsel %vm59_vm0, %v57_v21, 0.0  ;;  %vm104_vm2 = vcmask 1042434   ;;  %vm106_vm3 = vcmask 1043459   ;;  %vm108_vm4 = vcmask 1044484  }
  0x12   :  { %v81_v24 = vsel %vm59_vm0, %v58_v22, 0.0  ;;  %vm110_vm5 = vcmask 1045509   ;;  %vm112_vm6 = vcmask 1046534   ;;  %vm114_vm7 = vcmask 1047559  }
  0x13   :  { %vm149_vm8 = vcmask 58368  }
  0x18   :  { %64 = vadd.xlane.f32.xlu0 %v63_v16  ;;  %70 = vadd.xlane.f32.xlu1 %v69_v17 }
  0x19   :  { %76 = vadd.xlane.f32.xlu2 %v75_v18 }
  0x20   :  { %79 = vadd.xlane.f32.xlu0 %v78_v23  ;;  %82 = vadd.xlane.f32.xlu1 %v81_v24 }
  0x83   :  { %v62_v25 = vpop.xlane.xlu0 %61  ;;  %v68_v26 = vpop.xlane.xlu1 %67 }
  0x84   :  { %v74_v28 = vpop.xlane.xlu2 %73  ;;  %v94_v32 = vperm.slane %v62_v25, %v93_v29  ;;  %v96_v35 = vperm.slane %v68_v26, %v93_v29 }
  0x85   :  { %v98_v39 = vperm.slane %v74_v28, %v93_v29 }
  0x8b   :  { %v65_v30 = vpop.xlane.xlu0 %64  ;;  %v71_v31 = vpop.xlane.xlu1 %70 }
  0x8c   :  { %v95_v33 = vperm.slane %v65_v30, %v93_v29  ;;  %v97_v34 = vperm.slane %v71_v31, %v93_v29  ;;  %v77_v37 = vpop.xlane.xlu2 %76 }
  0x8d   :  { %v99_v41 = vperm.slane %v77_v37, %v93_v29 }
  0x8e   :  { %v103_v36 = vsel %vm102_vm1, %v95_v33, %v94_v32 }
  0x8f   :  { %v105_v38 = vsel %vm104_vm2, %v96_v35, %v103_v36 }
  0x90   :  { %v107_v40 = vsel %vm106_vm3, %v97_v34, %v105_v38 }
  0x91   :  { %v109_v42 = vsel %vm108_vm4, %v98_v39, %v107_v40 }
  0x92   :  { %v111_v47 = vsel %vm110_vm5, %v99_v41, %v109_v42 }
  0x93   :  { %v80_v43 = vpop.xlane.xlu0 %79  ;;  %v83_v44 = vpop.xlane.xlu1 %82 }
  0x94   :  { %v100_v45 = vperm.slane %v80_v43, %v93_v29  ;;  %v101_v46 = vperm.slane %v83_v44, %v93_v29 }
  0x96   :  { %v113_v48 = vsel %vm112_vm6, %v100_v45, %v111_v47 }
  0x97   :  { %v115_v49 = vsel %vm114_vm7, %v101_v46, %v113_v48 }
  0x98   :  { %117 = vxpose.xlu2.b32.start.end [1/1] (short) (narrow) %v115_v49, 8 }
 0x131   :  { %v133_v50 = vpop.trf.xlu2 }
 0x132   :  { %v150_v51 = vsel %vm149_vm8, %v133_v50, -inf }
 0x133   :  { %151 = vmax.xlane.f32.xlu0 %v150_v51 }
 0x1a6   :  { %v152_v52 = vpop.xlane.xlu0 %151 }
 0x1a7   :  { %v153_v53 = vsub.f32 %v133_v50, %v152_v52 }
 0x1a9   :  { %v154_v54 = vmul.f32 1.442695, %v153_v53 }
 0x1ab   :  { %199 = vpow2.f32 %v154_v54 }
 0x1b1   :  { %v200_v55 = vpop.eup %199 }
 0x1b2   :  { %v156_v56 = vsel %vm149_vm8, %v200_v55, 0.0 }
 0x1b3   :  { %157 = vadd.xlane.f32.xlu1 %v156_v56 }
 0x226   :  { %v158_v57 = vpop.xlane.xlu1 %157 }
 0x227   :  { %201 = vrcp.f32 %v158_v57  ;;  %v170_v61 = vand.u32 2147483648, %v158_v57  ;;  %v168_v63 = vand.u32 2147483647, %v158_v57  ;;  %vm164_vm10 = vweird.f32 %v158_v57 }
 0x229   :  { %v171_v1 = vor.u32 1.1754944e-38, %v170_v61  ;;  %vm169_vm12 = vcmp.eq.f32.partialorder %v168_v63, 8.507059e+37 }
 0x22d   :  { %v202_v58 = vpop.eup %201 }
 0x22e   :  { %v160_v59 = vmul.f32 %v202_v58, %v158_v57  ;;  %vm165_vm9 = vweird.f32 %v202_v58 }
 0x22f   :  { %vm166_vm11 = vmor %vm164_vm10, %vm165_vm9 }
 0x230   :  { %v161_v60 = vsub.f32 1.0, %v160_v59 }
 0x232   :  { %v162_v62 = vmul.f32 %v202_v58, %v161_v60 }
 0x234   :  { %v163_v0 = vadd.f32 %v202_v58, %v162_v62 }
 0x236   :  { %v167_v2 = vsel %vm166_vm11, %v202_v58, %v163_v0 }
 0x237   :  { %v172_v3 = vsel %vm169_vm12, %v171_v1, %v167_v2 }
 0x238   :  { %v173_v4 = vmul.f32 %v200_v55, %v172_v3 }
 0x23a   :  { %174 = vst.msk [vmem:[#allocation7] sm:$0x3] %vm149_vm8, %v173_v4 }
 0x23b   :  { %185 = dma.vmem_to_hbm [thread:$0]  %s181_s1, 32, %s183_s23, [#allocation4]  }
 0x23c   :  { %279 = dma.done.wait [#allocation4], 32  }
 0x23d   :  { %280 = vsyncadd [#allocation4], 4294967264 }
 0x23e   :  { %190 = vsyncpa [#allocation3], 1 }
 0x23f   :  { %191 = vsyncpa [#allocation6], 1 }
 0x240   :  { %192 = vsyncpa [#allocation4], 1 }

</bundles_post_ra>
